<compile_context>
chip_gen: v7x
topology: tpu7x:2x2x1
jax: 0.10.0
libtpu: 0.0.40
codegen_flags: <defaults>
</compile_context>

<pallas_src>
import functools
import math

import jax
import jax.numpy as jnp
from jax import lax
from jax.experimental import pallas as pl
from jax.experimental.pallas import tpu as pltpu


def _round_up(v, m):
    return ((v + m - 1) // m) * m


def _arcloss_kernel(x_ref, wt_ref, invx_ref, invw_ref, lab_ref, out_ref, cosa_ref,
                    *, s, cos_m, sin_m, th, easy_margin, block_c):
    """Computes one (TB, TC) tile of (output, cosa).

    Grid = (class tiles, batch tiles); class axis is the outer (slow) axis so
    the W^T tile loaded here is reused across every batch tile.
    """
    j = pl.program_id(0)                       # class-tile index (outer axis)

    # MXU: (TB, D) x (D, TC), f32 accumulation. W^T was pre-transposed and
    # pre-cast in the wrapper -> no per-tile XLU transpose, lane-dense in N.
    logits = jnp.dot(x_ref[...], wt_ref[...], preferred_element_type=jnp.float32)

    # Row norms (and the /10) folded in as a rank-1 post-matmul scale:
    #   cosa = (X W^T) * (0.1 / ||x||) * (1 / ||w||)
    cosa = logits * invx_ref[...] * invw_ref[...]          # (TB,1), (1,TC) broadcasts
    cosa_ref[...] = cosa.astype(cosa_ref.dtype)

    # Tile-local label compare (saves a full-tile add vs. a global column index).
    lab_local = lab_ref[...] - j * block_c                 # (TB, 1) int32
    in_tile = (lab_local >= 0) & (lab_local < block_c)
    has_target = jnp.max(in_tile.astype(jnp.int32)) > 0    # scalar flag

    # Margin math only on the ~TB/C fraction of tiles that hold a target column.
    @pl.when(has_target)
    def _():
        # cos(acos(c) + m) = c*cos(m) - sqrt(1 - c^2)*sin(m); |cosa| <= 0.1 here
        # because of the folded /10, so the identity is safe without clamping.
        sin_a = jnp.sqrt(jnp.maximum(1.0 - cosa * cosa, 0.0))
        cosam = cosa * cos_m - sin_a * sin_m
        if easy_margin:
            cosam = jnp.where(cosa > 0.0, cosam, cosa)
        else:
            cosam = jnp.where(cosa < th, cosam, cosa)
        tb, tc = out_ref.shape
        col = lax.broadcasted_iota(jnp.int32, (tb, tc), 1)
        out_ref[...] = s * jnp.where(col == lab_local, cosam, cosa)

    @pl.when(jnp.logical_not(has_target))
    def _():
        out_ref[...] = s * cosa


def prepare_arcloss_weight(weight, *, block_c=2048, matmul_dtype=jnp.bfloat16):
    """One-time weight preparation (cache this with the parameter between steps).

    Pads the class axis to a multiple of the class tile, transposes to (D, Cp),
    casts to the matmul streaming dtype and precomputes 1/||w||.  Doing this
    outside the training step avoids re-materializing a full copy of W in HBM
    on every call.
    """
    weight = jnp.asarray(weight, jnp.float32)
    C, D = weight.shape
    tc = min(block_c, _round_up(C, 128))       # lane-dense class tile
    cp = _round_up(C, tc)

    eps = 1e-12                                # F.normalize eps
    inv_w = lax.rsqrt(jnp.maximum(jnp.sum(weight * weight, axis=1, keepdims=True),
                                  eps * eps)).reshape(1, C)
    inv_w = jnp.pad(inv_w, ((0, 0), (0, cp - C)))          # padded cols -> scale 0
    wt = jnp.pad(weight, ((0, cp - C), (0, 0))).T.astype(matmul_dtype)   # (D, Cp)

    return dict(wt=wt, inv_w=inv_w, C=C, D=D, cp=cp, tc=tc,
                matmul_dtype=matmul_dtype)


def arc_loss_forward(x, prepped, label, *, s=64.0, m=0.5, easy_margin=True,
                     block_b=512, cosa_dtype=jnp.float32):
    x = jnp.asarray(x, jnp.float32)
    B, D = x.shape
    assert D == prepped["D"], "feature dims must match"
    C, cp, tc = prepped["C"], prepped["cp"], prepped["tc"]
    mm_dtype = prepped["matmul_dtype"]

    # ---- prologue (plain XLA, computed once per call): inverse row norms ----
    eps = 1e-12
    inv_x = lax.rsqrt(jnp.maximum(jnp.sum(x * x, axis=1, keepdims=True),
                                  eps * eps)) * 0.1        # fold the /10 here

    # TB multiple of 16 (bf16 sublane granularity), TC multiple of 128.
    tb = min(block_b, _round_up(B, 16))
    bp = _round_up(B, tb)

    xp = jnp.pad(x, ((0, bp - B), (0, 0))).astype(mm_dtype)   # cast in wrapper
    invxp = jnp.pad(inv_x, ((0, bp - B), (0, 0)))             # padded rows -> 0
    labp = jnp.pad(label.reshape(B, 1).astype(jnp.int32), ((0, bp - B), (0, 0)),
                   constant_values=-1)                        # -1 never matches

    # Class axis OUTER (slow) -> W streams from HBM exactly once per call and
    # is the axis megacore shards across the 2 TCs on v7x.
    grid = (cp // tc, bp // tb)

    kernel = functools.partial(
        _arcloss_kernel,
        s=float(s), cos_m=math.cos(m), sin_m=math.sin(m),
        th=math.cos(math.pi - m), easy_margin=bool(easy_margin), block_c=tc,
    )

    in_bytes = jnp.dtype(mm_dtype).itemsize
    cosa_bytes = jnp.dtype(cosa_dtype).itemsize
    # Double-buffered working set; keep it within v7x's 64 MiB/TC VMEM, and
    # above v5e's 16 MiB default scoped limit.
    vmem_bytes = (2 * (tb * D * in_bytes + D * tc * in_bytes
                       + tb * tc * (4 + cosa_bytes)) + (4 << 20))
    vmem_limit = int(min(max(vmem_bytes, 32 << 20), 64 << 20))

    cost = pl.CostEstimate(
        flops=int(2 * bp * cp * D + 10 * bp * cp),
        transcendentals=int(bp * cp),
        bytes_accessed=int((bp * D + cp * D) * in_bytes
                           + bp * cp * (4 + cosa_bytes) + 8 * bp + 4 * cp),
    )

    out_p, cosa_p = pl.pallas_call(
        kernel,
        grid=grid,
        in_specs=[
            pl.BlockSpec((tb, D), lambda j, i: (i, 0)),     # x tile (small, re-streamed)
            pl.BlockSpec((D, tc), lambda j, i: (0, j)),     # W^T tile (streamed once)
            pl.BlockSpec((tb, 1), lambda j, i: (i, 0)),     # 0.1/||x||
            pl.BlockSpec((1, tc), lambda j, i: (0, j)),     # 1/||w||
            pl.BlockSpec((tb, 1), lambda j, i: (i, 0)),     # labels
        ],
        out_specs=(
            pl.BlockSpec((tb, tc), lambda j, i: (i, j)),
            pl.BlockSpec((tb, tc), lambda j, i: (i, j)),
        ),
        out_shape=(
            jax.ShapeDtypeStruct((bp, cp), jnp.float32),
            jax.ShapeDtypeStruct((bp, cp), cosa_dtype),
        ),
        compiler_params=pltpu.CompilerParams(
            dimension_semantics=("parallel", "parallel"),
            vmem_limit_bytes=vmem_limit),
        cost_estimate=cost,
    )(xp, prepped["wt"], invxp, prepped["inv_w"], labp)

    if bp == B and cp == C:          # no padding -> no output slice copy
        return out_p, cosa_p
    return out_p[:B, :C], cosa_p[:B, :C]


def arc_loss(x, weight, label, *, s=64.0, m=0.5, easy_margin=True,
             matmul_dtype=jnp.bfloat16, cosa_dtype=jnp.float32):
    """Convenience wrapper (weight prep NOT cached — cache it in training)."""
    prepped = prepare_arcloss_weight(weight, matmul_dtype=matmul_dtype)
    return arc_loss_forward(x, prepped, label, s=s, m=m, easy_margin=easy_margin,
                            cosa_dtype=cosa_dtype)


def _reference(x, weight, label, *, s=64.0, m=0.5, easy_margin=True):
    eps = 1e-12
    xn = x / jnp.maximum(jnp.linalg.norm(x, axis=1, keepdims=True), eps)
    wn = weight / jnp.maximum(jnp.linalg.norm(weight, axis=1, keepdims=True), eps)
    cosa = (xn @ wn.T) / 10.0
    a = jnp.arccos(cosa)
    cosam = jnp.cos(a + m)
    if easy_margin:
        cosam = jnp.where(cosa > 0, cosam, cosa)
    else:
        cosam = jnp.where(cosa < math.cos(math.pi - m), cosam, cosa)
    one_hot = jax.nn.one_hot(label, weight.shape[0], dtype=jnp.float32)
    out = s * (one_hot * cosam) + s * ((1.0 - one_hot) * cosa)
    return out, cosa


if __name__ == "__main__":
    key = jax.random.PRNGKey(0)
    k_x, k_w, k_lab = jax.random.split(key, 3)

    B, in_feathers, out_feathers = 8, 32, 16

    x = jax.random.normal(k_x, (B, in_feathers), dtype=jnp.float32)

    # nn.init.xavier_uniform_ on a (out_feathers, in_feathers) weight.
    bound = math.sqrt(6.0 / (in_feathers + out_feathers))
    weight = jax.random.uniform(
        k_w, (out_feathers, in_feathers), minval=-bound, maxval=bound,
        dtype=jnp.float32,
    )
    label = jax.random.randint(k_lab, (B,), 0, out_feathers, dtype=jnp.int32)

    # ---- f32 streaming path: tight correctness check ------------------------
    prepped_f32 = prepare_arcloss_weight(weight, matmul_dtype=jnp.float32)
    out, cosa = arc_loss_forward(x, prepped_f32, label, s=64.0, m=0.5,
                                 easy_margin=True)
    out = jax.block_until_ready(out)
    cosa = jax.block_until_ready(cosa)

    ref_out, ref_cosa = _reference(x, weight, label, s=64.0, m=0.5,
                                   easy_margin=True)
    assert out.shape == ref_out.shape and cosa.shape == ref_cosa.shape
    assert jnp.allclose(out, ref_out, atol=1e-4, rtol=1e-4), "output mismatch"
    assert jnp.allclose(cosa, ref_cosa, atol=1e-5, rtol=1e-5), "cosa mismatch"

    # easy_margin=False branch (f32, tight check).
    out_h, cosa_h = arc_loss_forward(x, prepped_f32, label, s=64.0, m=0.5,
                                     easy_margin=False)
    ref_out_h, _ = _reference(x, weight, label, s=64.0, m=0.5, easy_margin=False)
    assert jnp.allclose(jax.block_until_ready(out_h), ref_out_h,
                        atol=1e-4, rtol=1e-4), "hard-margin output mismatch"

    # ---- default bf16-streaming path: relaxed check (f32 accumulation kept) --
    prepped_bf16 = prepare_arcloss_weight(weight)          # bf16 W^T, cached once
    out_b, cosa_b = arc_loss_forward(x, prepped_bf16, label, s=64.0, m=0.5,
                                     easy_margin=True)
    out_b = jax.block_until_ready(out_b)
    cosa_b = jax.block_until_ready(cosa_b)
    assert jnp.allclose(out_b, ref_out, atol=0.25, rtol=2e-2), "bf16 output mismatch"
    assert jnp.allclose(cosa_b, ref_cosa, atol=4e-3, rtol=2e-2), "bf16 cosa mismatch"

    print("KERNEL_OK")
</pallas_src>

<mosaic_0001>
module attributes {stable_mosaic.version = 11 : i64} {
  func.func @_arcloss_kernel(%arg0: i32, %arg1: i32, %arg2: memref<16x32xf32, #tpu.memory_space<vmem>>, %arg3: memref<32x128xf32, #tpu.memory_space<vmem>>, %arg4: memref<16x1xf32, #tpu.memory_space<vmem>>, %arg5: memref<1x128xf32, #tpu.memory_space<vmem>>, %arg6: memref<16x1xi32, #tpu.memory_space<vmem>>, %arg7: memref<16x128xf32, #tpu.memory_space<vmem>>, %arg8: memref<16x128xf32, #tpu.memory_space<vmem>>) attributes {dimension_semantics = [#tpu.dimension_semantics<parallel>, #tpu.dimension_semantics<parallel>], iteration_bounds = array<i64: 1, 1>, scalar_prefetch = 0 : i64, scratch_operands = 0 : i64, tpu.core_type = #tpu.core_type<tc>, window_params = [{transform_indices = @transform_0, window_bounds = array<i64: 16, 32>}, {transform_indices = @transform_1, window_bounds = array<i64: 32, 128>}, {transform_indices = @transform_2, window_bounds = array<i64: 16, 1>}, {transform_indices = @transform_3, window_bounds = array<i64: 1, 128>}, {transform_indices = @transform_4, window_bounds = array<i64: 16, 1>}, {transform_indices = @transform_5, window_bounds = array<i64: 16, 128>}, {transform_indices = @transform_6, window_bounds = array<i64: 16, 128>}]} {
    %c0 = arith.constant 0 : index
    %c0_0 = arith.constant 0 : index
    %0 = vector.load %arg2[%c0, %c0_0] : memref<16x32xf32, #tpu.memory_space<vmem>>, vector<16x32xf32>
    %c0_1 = arith.constant 0 : index
    %c0_2 = arith.constant 0 : index
    %1 = vector.load %arg3[%c0_1, %c0_2] : memref<32x128xf32, #tpu.memory_space<vmem>>, vector<32x128xf32>
    %cst = arith.constant dense<0.000000e+00> : vector<16x128xf32>
    %2 = tpu.matmul %0, %1, %cst {dimension_numbers = #tpu.dot_dimension_numbers<[1], [0], [0], [1], [0, 0, 1, 1], [], []>} : vector<16x32xf32>, vector<32x128xf32>, vector<16x128xf32> -> vector<16x128xf32>
    %c0_3 = arith.constant 0 : index
    %c0_4 = arith.constant 0 : index
    %3 = vector.load %arg4[%c0_3, %c0_4] : memref<16x1xf32, #tpu.memory_space<vmem>>, vector<16x1xf32>
    %4 = vector.broadcast %3 : vector<16x1xf32> to vector<16x128xf32>
    %5 = arith.mulf %2, %4 : vector<16x128xf32>
    %c0_5 = arith.constant 0 : index
    %c0_6 = arith.constant 0 : index
    %6 = vector.load %arg5[%c0_5, %c0_6] : memref<1x128xf32, #tpu.memory_space<vmem>>, vector<1x128xf32>
    %7 = vector.broadcast %6 : vector<1x128xf32> to vector<16x128xf32>
    %8 = arith.mulf %5, %7 : vector<16x128xf32>
    %c0_7 = arith.constant 0 : index
    %c0_8 = arith.constant 0 : index
    %9 = vector.load %arg8[%c0_7, %c0_8] : memref<16x128xf32, #tpu.memory_space<vmem>>, vector<16x128xf32>
    tpu.vector_store %arg8[%c0_7, %c0_8], %8 {strides = array<i32>} : memref<16x128xf32, #tpu.memory_space<vmem>>, vector<16x128xf32>,
    %c0_9 = arith.constant 0 : index
    %c0_10 = arith.constant 0 : index
    %10 = vector.load %arg6[%c0_9, %c0_10] : memref<16x1xi32, #tpu.memory_space<vmem>>, vector<16x1xi32>
    %c128_i32 = arith.constant 128 : i32
    %11 = arith.muli %arg0, %c128_i32 : i32
    %12 = vector.broadcast %11 : i32 to vector<16x1xi32>
    %13 = arith.subi %10, %12 : vector<16x1xi32>
    %c0_i32 = arith.constant 0 : i32
    %14 = vector.broadcast %c0_i32 : i32 to vector<16x1xi32>
    %15 = arith.cmpi sge, %13, %14 : vector<16x1xi32>
    %c128_i32_11 = arith.constant 128 : i32
    %16 = vector.broadcast %c128_i32_11 : i32 to vector<16x1xi32>
    %17 = arith.cmpi slt, %13, %16 : vector<16x1xi32>
    %18 = arith.andi %15, %17 : vector<16x1xi1>
    %19 = arith.extui %18 : vector<16x1xi1> to vector<16x1xi32>
    %20 = vector.shape_cast %19 : vector<16x1xi32> to vector<1x16x1xi32>
    %cst_12 = arith.constant dense<-2147483648> : vector<1xi32>
    %21 = vector.multi_reduction <maxsi>, %20, %cst_12 [1, 2] : vector<1x16x1xi32> to vector<1xi32>
    %22 = vector.shape_cast %21 : vector<1xi32> to vector<1x1x1xi32>
    %23 = vector.extract %22[0, 0, 0] : i32 from vector<1x1x1xi32>
    %c0_i32_13 = arith.constant 0 : i32
    %24 = arith.cmpi sgt, %23, %c0_i32_13 : i32
    %25 = arith.extui %24 : i1 to i32
    %c0_i32_14 = arith.constant 0 : i32
    %26 = arith.cmpi ne, %25, %c0_i32_14 : i32
    scf.if %26 {
      %30 = arith.mulf %8, %8 : vector<16x128xf32>
      %cst_16 = arith.constant 1.000000e+00 : f32
      %31 = vector.broadcast %cst_16 : f32 to vector<16x128xf32>
      %32 = arith.subf %31, %30 : vector<16x128xf32>
      %cst_17 = arith.constant 0.000000e+00 : f32
      %33 = vector.broadcast %cst_17 : f32 to vector<16x128xf32>
      %34 = arith.maximumf %32, %33 : vector<16x128xf32>
      %35 = math.sqrt %34 : vector<16x128xf32>
      %cst_18 = arith.constant 0.87758255 : f32
      %36 = vector.broadcast %cst_18 : f32 to vector<16x128xf32>
      %37 = arith.mulf %8, %36 : vector<16x128xf32>
      %cst_19 = arith.constant 0.47942555 : f32
      %38 = vector.broadcast %cst_19 : f32 to vector<16x128xf32>
      %39 = arith.mulf %35, %38 : vector<16x128xf32>
      %40 = arith.subf %37, %39 : vector<16x128xf32>
      %cst_20 = arith.constant 0.000000e+00 : f32
      %41 = vector.broadcast %cst_20 : f32 to vector<16x128xf32>
      %42 = arith.cmpf ogt, %8, %41 : vector<16x128xf32>
      %43 = arith.select %42, %40, %8 : vector<16x128xi1>, vector<16x128xf32>
      %44 = tpu.iota {dimensions = array<i32: 1>} : vector<16x128xi32>
      %45 = vector.broadcast %13 : vector<16x1xi32> to vector<16x128xi32>
      %46 = arith.cmpi eq, %44, %45 : vector<16x128xi32>
      %47 = arith.select %46, %43, %8 : vector<16x128xi1>, vector<16x128xf32>
      %cst_21 = arith.constant 6.400000e+01 : f32
      %48 = vector.broadcast %cst_21 : f32 to vector<16x128xf32>
      %49 = arith.mulf %48, %47 : vector<16x128xf32>
      %c0_22 = arith.constant 0 : index
      %c0_23 = arith.constant 0 : index
      %50 = vector.load %arg7[%c0_22, %c0_23] : memref<16x128xf32, #tpu.memory_space<vmem>>, vector<16x128xf32>
      tpu.vector_store %arg7[%c0_22, %c0_23], %49 {strides = array<i32>} : memref<16x128xf32, #tpu.memory_space<vmem>>, vector<16x128xf32>,
    } else {
    }
    %true = arith.constant true
    %27 = arith.xori %24, %true : i1
    %28 = arith.extui %27 : i1 to i32
    %c0_i32_15 = arith.constant 0 : i32
    %29 = arith.cmpi ne, %28, %c0_i32_15 : i32
    scf.if %29 {
      %cst_16 = arith.constant 6.400000e+01 : f32
      %30 = vector.broadcast %cst_16 : f32 to vector<16x128xf32>
      %31 = arith.mulf %30, %8 : vector<16x128xf32>
      %c0_17 = arith.constant 0 : index
      %c0_18 = arith.constant 0 : index
      %32 = vector.load %arg7[%c0_17, %c0_18] : memref<16x128xf32, #tpu.memory_space<vmem>>, vector<16x128xf32>
      tpu.vector_store %arg7[%c0_17, %c0_18], %31 {strides = array<i32>} : memref<16x128xf32, #tpu.memory_space<vmem>>, vector<16x128xf32>,
    } else {
    }
    return
  }
  func.func @transform_0(%arg0: i32, %arg1: i32) -> (i32, i32) {
    %c0_i32 = arith.constant 0 : i32
    %c0_i32_0 = arith.constant 0 : i32
    return %arg1, %c0_i32 : i32, i32
  }
  func.func @transform_1(%arg0: i32, %arg1: i32) -> (i32, i32) {
    %c0_i32 = arith.constant 0 : i32
    %c0_i32_0 = arith.constant 0 : i32
    return %c0_i32, %arg0 : i32, i32
  }
  func.func @transform_2(%arg0: i32, %arg1: i32) -> (i32, i32) {
    %c0_i32 = arith.constant 0 : i32
    %c0_i32_0 = arith.constant 0 : i32
    return %arg1, %c0_i32 : i32, i32
  }
  func.func @transform_3(%arg0: i32, %arg1: i32) -> (i32, i32) {
    %c0_i32 = arith.constant 0 : i32
    %c0_i32_0 = arith.constant 0 : i32
    return %c0_i32, %arg0 : i32, i32
  }
  func.func @transform_4(%arg0: i32, %arg1: i32) -> (i32, i32) {
    %c0_i32 = arith.constant 0 : i32
    %c0_i32_0 = arith.constant 0 : i32
    return %arg1, %c0_i32 : i32, i32
  }
  func.func @transform_5(%arg0: i32, %arg1: i32) -> (i32, i32) {
    %c0_i32 = arith.constant 0 : i32
    return %arg1, %arg0 : i32, i32
  }
  func.func @transform_6(%arg0: i32, %arg1: i32) -> (i32, i32) {
    %c0_i32 = arith.constant 0 : i32
    return %arg1, %arg0 : i32, i32
  }
}

</mosaic_0001>

<bundles_post_ra>
// kernel: tpu_custom_call.1
= control target key start
LH: loop header
LB: loop body
LE: loop exit
PB: predicated region body
PF: predicated region fallthrough
CT: control target
= control target key end

     0   :  { %12 = vsyncpa [#allocation3], 0  ;;  %s562_s0 = inlined_call_operand.hbm [shape: f32[16,32], index: 0, kind: input, shape index: {}]   ;;  %s563_s1 = inlined_call_operand.vmem [shape: f32[32,128], index: 1, kind: input, shape index: {}]   ;;  %s564_s2 = inlined_call_operand.vmem [shape: f32[16,1], index: 2, kind: input, shape index: {}]   ;;  %s565_s3 = inlined_call_operand.vmem [shape: f32[1,128], index: 3, kind: input, shape index: {}]   ;;  %s566_s4 = inlined_call_operand.vmem [shape: s32[16,1], index: 4, kind: input, shape index: {}]   ;;  %s567_s5 = inlined_call_operand.hbm [shape: f32[16,128], index: 5, kind: output, shape index: {0}]   ;;  %s568_s6 = inlined_call_operand.hbm [shape: f32[16,128], index: 6, kind: output, shape index: {1}]  }
   0x1   :  { %13 = vsyncpa [#allocation4], 0 }
   0x2   :  { %14 = vsyncpa [#allocation7], 0  ;;  %s403_s21 = smov [#allocation2]   ;;  %s331_s25 = scalar_lea.hbm %s562_s0, 256 }
   0x3   :  { %s20_s22 = sshll.u32 %s403_s21, 4  ;;  %p332_p0 = scmp.ne.s32.totalorder %s562_s0, %s331_s25  ;;  %s21_s22 = int_to_ptr.vmem [resolvable:$true] %s20_s22 }
   0x4   :  { %p335_p1 = scmp.lt.u32.totalorder %s331_s25, %s562_s0 }
   0x6   :  { %p337_p2 = pnand %p335_p1, %p332_p0 }
   0x8   :  { %340 = shalt.err (!%p337_p2)
}
   0x9   :  { %s341_s30 = scalar_lea.vmem %s21_s22, 256  ;;  %p346_p4 = scmp.lt.s32.totalorder %s21_s22, %s21_s22 }
   0xa   :  { %p342_p3 = scmp.ne.s32.totalorder %s21_s22, %s341_s30  ;;  %p347_p5 = scmp.lt.s32.totalorder %s341_s30, %s341_s30 }
   0xc   :  { %p348_p6 = por %p347_p5, %p346_p4 }
   0xe   :  { %p349_p7 = pnand %p348_p6, %p342_p3 }
  0x10   :  { %352 = shalt.err (!%p349_p7)
}
  0x11   :  { %s404_s7 = smov 128   ;;  %s405_s8 = smov 8  }
  0x12   :  { %26 = dma.hbm_to_vmem [thread:$0]  %s562_s0, 256, %s21_s22, [#allocation3], %s404_s7, %s404_s7, %s405_s8  }
  0x13   :  { %397 = dma.done.wait [#allocation3], 256  }
  0x14   :  { %398 = vsyncadd [#allocation3], 4294967040  ;;  %v406_v0 = vmov 0   ;;  %v463_v1 = vld [vmem:[%s566_s4] sm:$0xff]  ;;  %v468_v2 = vld [vmem:[%s566_s4 + $0x8] sm:$0xff]  ;;  %vm165_vm0 = vcmask 7168  }
  0x15   :  { %324 = vset.pattern.permute.xlu1 %v406_v0  ;;  %325 = vset.pattern.permute.xlu0 %v406_v0  ;;  %v40_v3 = vld [vmem:[%s563_s1] sm:$0xff]  ;;  %vm44_vm1 = vcmask 261120   ;;  %vm157_vm2 = vcmp.ge.s32.totalorder %v463_v1, 0  ;;  %vm158_vm3 = vcmp.ge.s32.totalorder %v468_v2, 0  ;;  %vm159_vm4 = vcmp.lt.s32.totalorder %v463_v1, 128  ;;  %v41_v4 = vld [vmem:[%s563_s1 + $0x8] sm:$0xff] }
  0x16   :  { %vm160_vm5 = vcmp.lt.s32.totalorder %v468_v2, 128  ;;  %v42_v5 = vld [vmem:[%s563_s1 + $0x10] sm:$0xff]  ;;  %vm161_vm6 = vmand %vm157_vm2, %vm159_vm4  ;;  %v307_v6 = vpack.c.bf16 %v41_v4, %v40_v3  ;;  %v43_v7 = vld [vmem:[%s563_s1 + $0x18] sm:$0xff] }
  0x17   :  { %v38_v8 = vld [vmem:[#allocation2] sm:$0xff]  ;;  %vm162_vm7 = vmand %vm158_vm3, %vm160_vm5  ;;  %v163_v9 = vsel %vm161_vm6, 1, %v406_v0  ;;  %v311_v10 = vpack.c.bf16 %v43_v7, %v42_v5  ;;  %v39_v16 = vld [vmem:[#allocation2 + $0x8] sm:$0xff] }
  0x18   :  { %304 = vmatprep.mubr.msk.f32.mxu0 %vm44_vm1, %v38_v8  ;;  %v164_v11 = vsel %vm162_vm7, 1, %v406_v0  ;;  %v166_v12 = vsel %vm165_vm0, %v163_v9, 2147483648  ;;  %308 = vmatprep.subr.bf16.mxu0 %v307_v6  ;;  %v126_v18 = vld [vmem:[%s564_s2] sm:$0xff]  ;;  %v127_v19 = vld [vmem:[%s564_s2 + $0x8] sm:$0xff] }
  0x19   :  { %v167_v13 = vsel %vm165_vm0, %v164_v11, 2147483648  ;;  %310 = vmatpush3.bf16.msra.mxu0 %v307_v6  ;;  %130 = vperm.xlu1 %324, %v126_v18   ;;  %v287_v27 = vld [vmem:[%s565_s3] ss:$0 sm:$0xff] }
  0x1a   :  { %vm168_vm8 = vcmp.gt.s32.totalorder %v166_v12, %v167_v13  ;;  %312 = vmatprep.subr.bf16.mxu0 %v311_v10 }
  0x1b   :  { %v169_v14 = vsel %vm168_vm8, %v166_v12, %v167_v13 }
  0x1c   :  { %v171_v15 = vshra.s32 %v169_v14, 16  ;;  %v170_v20 = vand.u32 65535, %v169_v14 }
  0x1d   :  { %314 = vmatpush3.bf16.msra.mxu0 %v311_v10  ;;  %135 = vperm.xlu1 %324, %v127_v19  }
  0x1e   :  { %v173_v17 = vcvt.s32.f32 %v171_v15  ;;  %v172_v21 = vcvt.s32.f32 %v170_v20 }
  0x20   :  { %174 = vmax.xlane.f32.xlu0 %v173_v17  ;;  %305 = vmatmul.mubr.msk.f32.vlgmr.msra.gmra.mrb[0].mxu0 %vm44_vm1, %v39_v16 }
  0x98   :  { %v131_v24 = vpop.permute.xlu1 %130 }
  0x9c   :  { %v136_v25 = vpop.permute.xlu1 %135 }
  0xad   :  { %v175_v22 = vpop.xlane.xlu0 %174 }
  0xae   :  { %vm176_vm9 = vcmp.eq.f32.partialorder %v173_v17, %v175_v22  ;;  %v181_v33 = vcvt.f32.s32 %v175_v22 }
  0xaf   :  { %v177_v23 = vsel %vm176_vm9, %v172_v21, -inf }
  0xb0   :  { %178 = vmax.xlane.f32.xlu0 %v177_v23  ;;  %v182_v35 = vshll.u32 %v181_v33, 16 }
  0xf3   :  { %v306_v26 = vpop.f32.mrb[0].mxu0 }
  0xf4   :  { %v139_v28 = vmul.f32 %v306_v26, %v136_v25  ;;  %v117_v29 = vpop.f32.mrb[1].mxu0 }
  0xf5   :  { %v138_v30 = vmul.f32 %v131_v24, %v117_v29 }
  0xf6   :  { %v499_v31 = vmul.f32 %v287_v27, %v139_v28 }
  0xf7   :  { %v501_v32 = vmul.f32 %v287_v27, %v138_v30 }
  0xf8   :  { %150 = vst [vmem:[#allocation6 + $0x8] sm:$0xff] %v499_v31 }
  0xf9   :  { %149 = vst [vmem:[#allocation6] sm:$0xff] %v501_v32 }
 0x13d   :  { %v179_v34 = vpop.xlane.xlu0 %178 }
 0x13e   :  { %v180_v36 = vcvt.f32.s32 %v179_v34 }
 0x140   :  { %v183_v37 = vadd.s32 %v182_v35, %v180_v36 }
 0x142   :  { %v184_v38 = vrot.slane %v183_v37, 4 }
 0x144   :  { %vm185_vm10 = vcmp.gt.s32.totalorder %v183_v37, %v184_v38 }
 0x145   :  { %v186_v39 = vsel %vm185_vm10, %v183_v37, %v184_v38 }
 0x146   :  { %v187_v40 = vrot.slane %v186_v39, 2 }
 0x148   :  { %vm188_vm11 = vcmp.gt.s32.totalorder %v186_v39, %v187_v40 }
 0x149   :  { %v189_v41 = vsel %vm188_vm11, %v186_v39, %v187_v40 }
 0x14a   :  { %v190_v42 = vrot.slane %v189_v41, 1 }
 0x14c   :  { %vm191_vm12 = vcmp.gt.s32.totalorder %v189_v41, %v190_v42 }
 0x14d   :  { %v192_v43 = vsel %vm191_vm12, %v189_v41, %v190_v42 }
 0x14e   :  { %315 = vpush %v192_v43 }
 0x17f   :  { %s505_s2 = spop %315 }
 0x180   :  { %p288_p8 = scmp.le.s32.totalorder %s505_s2, 0 }
 0x181   :  { %v407_v44 = vmov (!%p288_p8), 0   ;;  %v198_v45 = vmul.f32 (!%p288_p8), %v501_v32, %v501_v32  ;;  %v199_v47 = vmul.f32 (!%p288_p8), %v499_v31, %v499_v31  ;;  %v218_v60 = vmul.f32 (!%p288_p8), 0.87758255, %v501_v32 }
 0x182   :  { %197 = sbr.rel (%p288_p8) target bundleno = 524 (0x20c), region = 29  ;;  %326 = vset.pattern.permute.xlu0 (!%p288_p8), %v407_v44  ;;  %v228_v63 = vlaneseq (!%p288_p8)  ;;  %vm224_vm1 = vcmp.gt.f32.partialorder (!%p288_p8), %v501_v32, 0.0  ;;  %vm225_vm2 = vcmp.gt.f32.partialorder (!%p288_p8), %v499_v31, 0.0 }
 0x183   :  { %231 = vperm.xlu0 (!%p288_p8), %326, %v463_v1   ;;  %v200_v46 = vsub.f32 (!%p288_p8), 1.0, %v198_v45  ;;  %v201_v49 = vsub.f32 (!%p288_p8), 1.0, %v199_v47  ;;  %v219_v1 = vmul.f32 (!%p288_p8), 0.87758255, %v499_v31 }
 0x184   :  { %v229_v3 = vand.u32 (!%p288_p8), 127, %v228_v63 }
 0x185   :  { %v202_v48 = vmax.f32 (!%p288_p8), %v200_v46, 0.0  ;;  %v203_v50 = vmax.f32 (!%p288_p8), %v201_v49, 0.0 }
 0x187   :  { %234 = vperm.xlu0 (!%p288_p8), %326, %v468_v2   ;;  %327 = vrsqrt.f32 (!%p288_p8), %v202_v48  ;;  %vm206_vm13 = vcmp.eq.f32.partialorder (!%p288_p8), %v202_v48, inf  ;;  %v209_v54 = vand.u32 (!%p288_p8), 2147483648, %v202_v48  ;;  %vm208_vm14 = vcmp.eq.f32.partialorder (!%p288_p8), %v202_v48, 0.0 }
 0x188   :  { %329 = vrsqrt.f32 (!%p288_p8), %v203_v50  ;;  %vm213_vm15 = vcmp.eq.f32.partialorder (!%p288_p8), %v203_v50, inf  ;;  %v216_v58 = vand.u32 (!%p288_p8), 2147483648, %v203_v50  ;;  %vm215_vm0 = vcmp.eq.f32.partialorder (!%p288_p8), %v203_v50, 0.0 }
 0x191   :  { %v328_v51 = vpop.eup %327 }
 0x192   :  { %v205_v52 = vmul.f32 %v328_v51, %v202_v48  ;;  %v330_v53 = vpop.eup %329 }
 0x193   :  { %v212_v56 = vmul.f32 %v330_v53, %v203_v50 }
 0x194   :  { %v207_v55 = vsel %vm206_vm13, %v202_v48, %v205_v52 }
 0x195   :  { %v210_v57 = vsel %vm208_vm14, %v209_v54, %v207_v55  ;;  %v214_v59 = vsel %vm213_vm15, %v203_v50, %v212_v56 }
 0x196   :  { %v220_v61 = vmul.f32 0.47942555, %v210_v57  ;;  %v217_v62 = vsel %vm215_vm0, %v216_v58, %v214_v59 }
 0x197   :  { %v221_v2 = vmul.f32 0.47942555, %v217_v62 }
 0x198   :  { %v222_v0 = vsub.f32 %v218_v60, %v220_v61 }
 0x199   :  { %v223_v5 = vsub.f32 %v219_v1, %v221_v2 }
 0x19a   :  { %v226_v4 = vsel %vm224_vm1, %v222_v0, %v501_v32 }
 0x19b   :  { %v227_v9 = vsel %vm225_vm2, %v223_v5, %v499_v31 }
 0x202   :  { %v232_v6 = vpop.permute.xlu0 %231 }
 0x203   :  { %vm236_vm3 = vcmp.eq.s32.totalorder %v229_v3, %v232_v6 }
 0x204   :  { %v238_v7 = vsel %vm236_vm3, %v226_v4, %v501_v32 }
 0x205   :  { %v240_v8 = vmul.f32 64.0, %v238_v7 }
 0x206   :  { %v235_v10 = vpop.permute.xlu0 %234 }
 0x207   :  { %242 = vst [vmem:[#allocation5] sm:$0xff] %v240_v8  ;;  %vm237_vm4 = vcmp.eq.s32.totalorder %v229_v3, %v235_v10 }
 0x208   :  { %v239_v11 = vsel %vm237_vm4, %v227_v9, %v499_v31 }
 0x209   :  { %v241_v12 = vmul.f32 64.0, %v239_v11 }
 0x20b   :  { %243 = vst [vmem:[#allocation5 + $0x8] sm:$0xff] %v241_v12 }
 0x20c PF:  { %p289_p9 = scmp.gt.s32.totalorder %s505_s2, 0 }
 0x20d   :  { %v248_v13 = vmul.f32 (!%p289_p9), 64.0, %v501_v32  ;;  %v249_v14 = vmul.f32 (!%p289_p9), 64.0, %v499_v31 }
 0x20e   :  { %247 = sbr.rel (%p289_p9) target bundleno = 533 (0x215), region = 33 }
 0x20f   :  { %250 = vst [vmem:[#allocation5] sm:$0xff] (!%p289_p9), %v248_v13  ;;  %251 = vst [vmem:[#allocation5 + $0x8] sm:$0xff] (!%p289_p9), %v249_v14 }
 0x215 PF:  { %s408_s3 = smov [#allocation5]   ;;  %s409_s27 = smov [#allocation6]  }
 0x216   :  { %s257_s26 = sshll.u32 %s408_s3, 4  ;;  %s269_s28 = sshll.u32 %s409_s27, 4  ;;  %s258_s26 = int_to_ptr.vmem [resolvable:$true] %s257_s26  ;;  %s525_s28 = int_to_ptr.vmem [resolvable:$true] %s269_s28 }
 0x217   :  { %s353_s29 = scalar_lea.vmem %s258_s26, 256  ;;  %p358_p11 = scmp.lt.s32.totalorder %s258_s26, %s258_s26 }
 0x218   :  { %p354_p10 = scmp.ne.s32.totalorder %s258_s26, %s353_s29  ;;  %p359_p12 = scmp.lt.s32.totalorder %s353_s29, %s353_s29 }
 0x21a   :  { %p360_p13 = por %p359_p12, %p358_p11 }
 0x21c   :  { %p361_p0 = pnand %p360_p13, %p354_p10 }
 0x21e   :  { %364 = shalt.err (!%p361_p0)
}
 0x21f   :  { %s365_s10 = scalar_lea.hbm %s567_s5, 256 }
 0x220   :  { %p366_p1 = scmp.ne.s32.totalorder %s567_s5, %s365_s10  ;;  %p369_p2 = scmp.lt.u32.totalorder %s365_s10, %s567_s5 }
 0x222   :  { %p371_p3 = pnand %p369_p2, %p366_p1 }
 0x224   :  { %374 = shalt.err (!%p371_p3)
}
 0x225   :  { %263 = dma.vmem_to_hbm [thread:$0]  %s258_s26, 256, %s567_s5, [#allocation4], %s404_s7, %s404_s7, %s405_s8  }
 0x226   :  { %s375_s0 = scalar_lea.vmem %s525_s28, 256  ;;  %p380_p5 = scmp.lt.s32.totalorder %s525_s28, %s525_s28 }
 0x227   :  { %p376_p4 = scmp.ne.s32.totalorder %s525_s28, %s375_s0  ;;  %p381_p6 = scmp.lt.s32.totalorder %s375_s0, %s375_s0 }
 0x229   :  { %p382_p7 = por %p381_p6, %p380_p5 }
 0x22b   :  { %p383_p8 = pnand %p382_p7, %p376_p4 }
 0x22d   :  { %386 = shalt.err (!%p383_p8)
}
 0x22e   :  { %s387_s18 = scalar_lea.hbm %s568_s6, 256 }
 0x22f   :  { %p388_p9 = scmp.ne.s32.totalorder %s568_s6, %s387_s18  ;;  %p391_p10 = scmp.lt.u32.totalorder %s387_s18, %s568_s6 }
 0x231   :  { %p393_p11 = pnand %p391_p10, %p388_p9 }
 0x233   :  { %396 = shalt.err (!%p393_p11)
}
 0x234   :  { %275 = dma.vmem_to_hbm [thread:$0]  %s525_s28, 256, %s568_s6, [#allocation7], %s404_s7, %s404_s7, %s405_s8  }
 0x235   :  { %399 = dma.done.wait [#allocation4], 256  }
 0x236   :  { %400 = vsyncadd [#allocation4], 4294967040 }
 0x237   :  { %401 = dma.done.wait [#allocation7], 256  }
 0x238   :  { %402 = vsyncadd [#allocation7], 4294967040 }
 0x239   :  { %282 = vsyncpa [#allocation3], 1 }
 0x23a   :  { %283 = vsyncpa [#allocation4], 1 }
 0x23b   :  { %284 = vsyncpa [#allocation7], 1 }

</bundles_post_ra>
